<compile_context>
chip_gen: v7x
topology: tpu7x:2x2x1
jax: 0.10.0
libtpu: 0.0.40
codegen_flags: <defaults>
</compile_context>

<pallas_src>
import functools

import jax
import jax.numpy as jnp
from jax.experimental import pallas as pl
from jax.experimental.pallas import tpu as pltpu

LANE = 128
SUBLANE = 8


def _round_up(x, m):
    return (x + m - 1) // m * m


def _fused_mlp_kernel(*refs, num_hidden):
    """refs = (x, w0, b0, ..., w_{H-1}, b_{H-1}, w_last_row, b_last, o).

    Hidden layers run on the MXU (bf16 in, f32 accumulate); the final
    Linear(H, 1) runs on the VPU/XLU as a broadcast-multiply + lane reduction
    so no 127/128-zero matmul and no lane-padded output slab are needed.
    """
    x_ref = refs[0]
    w_last_ref, b_last_ref, o_ref = refs[-3], refs[-2], refs[-1]

    h = x_ref[...].astype(jnp.float32)
    for layer in range(num_hidden):
        w_ref = refs[1 + 2 * layer]
        b_ref = refs[2 + 2 * layer]
        # Cast only at the MXU input; keep bias-add / ReLU in f32 (v5e-safe).
        h = jnp.dot(h.astype(w_ref.dtype), w_ref[...],
                    preferred_element_type=jnp.float32)
        h = jnp.maximum(h + b_ref[...], 0.0)

    out = jnp.sum(h * w_last_ref[...], axis=-1, keepdims=True) + b_last_ref[...]
    o_ref[...] = out.astype(o_ref.dtype)


def dnn_forward(x, params, *, tm_max=512, compute_dtype=jnp.bfloat16):
    """Fused forward pass of DNN(channels): (Linear+ReLU)* then Linear(., 1).

    params: list of (w, b) with w stored as (in, out); the last entry is the
    final Linear(., 1).
    """
    batch, c_in = x.shape
    num_hidden = len(params) - 1  # all but the final Linear(., 1)

    # ---- hidden layers: lane-pad N to 128 (zeros -> exact), keep real K for
    # layer 0; store padded weights in compute_dtype (bf16 by default). -------
    hidden = []
    prev_width = c_in
    for (w, b) in params[:num_hidden]:
        n_pad = _round_up(w.shape[1], LANE)
        wp = (jnp.zeros((prev_width, n_pad), jnp.float32)
              .at[: w.shape[0], : w.shape[1]].set(w)
              .astype(compute_dtype))
        bp = jnp.zeros((1, n_pad), jnp.float32).at[0, : b.shape[0]].set(b)
        hidden.append((wp, bp))
        prev_width = n_pad

    # ---- final Linear(prev_width, 1): f32 row for the VPU/XLU path ----------
    w_last, b_last = params[-1]
    w_last_row = (jnp.zeros((1, prev_width), jnp.float32)
                  .at[0, : w_last.shape[0]].set(w_last[:, 0].astype(jnp.float32)))
    b_last_s = jnp.reshape(b_last.astype(jnp.float32), (1, 1))

    # ---- batch tiling: >=2 grid steps when batch allows (v7x megacore),
    # no round-up of batch to a multiple of tm (ragged tail is masked). -------
    tm = min(tm_max, _round_up(pl.cdiv(batch, 2), SUBLANE))
    if tm >= batch:
        tm = batch
    grid = (pl.cdiv(batch, tm),)

    flat_args = [x]
    in_specs = [pl.BlockSpec((tm, c_in), lambda i: (i, 0))]
    for wp, bp in hidden:
        flat_args.extend([wp, bp])
        # Constant block index -> weights resident in VMEM across the grid.
        in_specs.append(pl.BlockSpec(wp.shape, lambda i: (0, 0)))
        in_specs.append(pl.BlockSpec(bp.shape, lambda i: (0, 0)))
    flat_args.extend([w_last_row, b_last_s])
    in_specs.append(pl.BlockSpec(w_last_row.shape, lambda i: (0, 0)))
    in_specs.append(pl.BlockSpec(b_last_s.shape, lambda i: (0, 0)))

    # TODO(synk): for production hidden widths (>=2048), add a VMEM budget
    # guard / K-N grid axis with a pl.when accumulator — the resident bf16
    # weights must fit v7x's 64 MiB (vs 128 MiB on v5e/v6e).

    flops = 2 * batch * sum(int(wp.shape[0]) * int(wp.shape[1]) for wp, _ in hidden)
    flops += 2 * batch * prev_width
    bytes_accessed = (
        int(x.size) * x.dtype.itemsize
        + sum(int(wp.size) * wp.dtype.itemsize + int(bp.size) * bp.dtype.itemsize
              for wp, bp in hidden)
        + int(w_last_row.size) * 4 + 4
        + batch * 4
    )

    kernel = functools.partial(_fused_mlp_kernel, num_hidden=num_hidden)
    out = pl.pallas_call(
        kernel,
        out_shape=jax.ShapeDtypeStruct((batch, 1), x.dtype),
        grid=grid,
        in_specs=in_specs,
        out_specs=pl.BlockSpec((tm, 1), lambda i: (i, 0)),
        compiler_params=pltpu.CompilerParams(
            dimension_semantics=("parallel",),
        ),
        cost_estimate=pl.CostEstimate(
            flops=flops, transcendentals=0, bytes_accessed=bytes_accessed
        ),
    )(*flat_args)
    return out


def init_dnn_params(key, channels):
    """Parameters matching DNN(channels): Linear(c_i, c_{i+1})+ReLU, ..., Linear(c_L, 1).

    W is stored as (in, out) (transpose of PyTorch's (out, in) layout).
    """
    dims = list(channels) + [1]
    params = []
    for i in range(len(dims) - 1):
        c_i, c_o = dims[i], dims[i + 1]
        key, wk, bk = jax.random.split(key, 3)
        bound = 1.0 / jnp.sqrt(c_i)
        w = jax.random.uniform(wk, (c_i, c_o), jnp.float32, -bound, bound)
        b = jax.random.uniform(bk, (c_o,), jnp.float32, -bound, bound)
        params.append((w, b))
    return params


def dnn_forward_ref(x, params):
    h = x
    for idx, (w, b) in enumerate(params):
        h = h @ w + b[None, :]
        if idx != len(params) - 1:
            h = jnp.maximum(h, 0.0)
    return h


if __name__ == "__main__":
    key = jax.random.PRNGKey(0)
    key, xk = jax.random.split(key)

    # DNN(channels=[32, 64, 32]) -> Linear(32,64)+ReLU, Linear(64,32)+ReLU,
    # Linear(32,1)
    channels = [32, 64, 32]
    batch = 8

    x = jax.random.normal(xk, (batch, channels[0]), jnp.float32)
    params = init_dnn_params(key, channels)
    ref = dnn_forward_ref(x, params)

    fwd = jax.jit(dnn_forward, static_argnames=("tm_max", "compute_dtype"))

    # Exact f32 path (validates kernel semantics against the reference).
    out_f32 = jax.block_until_ready(fwd(x, params, compute_dtype=jnp.float32))
    assert out_f32.shape == (batch, 1), out_f32.shape
    assert jnp.allclose(out_f32, ref, atol=1e-5, rtol=1e-5), (
        f"f32 max err {jnp.max(jnp.abs(out_f32 - ref))}"
    )

    # Default perf path: bf16 MXU inputs, f32 accumulation (relaxed tolerance).
    out_bf16 = jax.block_until_ready(fwd(x, params))
    assert out_bf16.shape == (batch, 1), out_bf16.shape
    assert jnp.allclose(out_bf16, ref, atol=1e-1, rtol=1e-1), (
        f"bf16 max err {jnp.max(jnp.abs(out_bf16 - ref))}"
    )

    print("KERNEL_OK")
</pallas_src>

<mosaic_0001>
module attributes {stable_mosaic.version = 11 : i64} {
  func.func @_fused_mlp_kernel(%arg0: i32, %arg1: memref<8x32xf32, #tpu.memory_space<vmem>>, %arg2: memref<32x128xf32, #tpu.memory_space<vmem>>, %arg3: memref<1x128xf32, #tpu.memory_space<vmem>>, %arg4: memref<128x128xf32, #tpu.memory_space<vmem>>, %arg5: memref<1x128xf32, #tpu.memory_space<vmem>>, %arg6: memref<1x128xf32, #tpu.memory_space<vmem>>, %arg7: memref<1x1xf32, #tpu.memory_space<vmem>>, %arg8: memref<8x1xf32, #tpu.memory_space<vmem>>) attributes {dimension_semantics = [#tpu.dimension_semantics<parallel>], iteration_bounds = array<i64: 1>, scalar_prefetch = 0 : i64, scratch_operands = 0 : i64, tpu.core_type = #tpu.core_type<tc>, window_params = [{transform_indices = @transform_0, window_bounds = array<i64: 8, 32>}, {pipeline_mode = #tpu.pipeline_mode<synchronous>, transform_indices = @transform_1, window_bounds = array<i64: 32, 128>}, {pipeline_mode = #tpu.pipeline_mode<synchronous>, transform_indices = @transform_2, window_bounds = array<i64: 1, 128>}, {pipeline_mode = #tpu.pipeline_mode<synchronous>, transform_indices = @transform_3, window_bounds = array<i64: 128, 128>}, {pipeline_mode = #tpu.pipeline_mode<synchronous>, transform_indices = @transform_4, window_bounds = array<i64: 1, 128>}, {pipeline_mode = #tpu.pipeline_mode<synchronous>, transform_indices = @transform_5, window_bounds = array<i64: 1, 128>}, {pipeline_mode = #tpu.pipeline_mode<synchronous>, transform_indices = @transform_6, window_bounds = array<i64: 1, 1>}, {transform_indices = @transform_7, window_bounds = array<i64: 8, 1>}]} {
    %c0 = arith.constant 0 : index
    %c0_0 = arith.constant 0 : index
    %0 = vector.load %arg1[%c0, %c0_0] : memref<8x32xf32, #tpu.memory_space<vmem>>, vector<8x32xf32>
    %c0_1 = arith.constant 0 : index
    %c0_2 = arith.constant 0 : index
    %1 = vector.load %arg2[%c0_1, %c0_2] : memref<32x128xf32, #tpu.memory_space<vmem>>, vector<32x128xf32>
    %cst = arith.constant dense<0.000000e+00> : vector<8x128xf32>
    %2 = tpu.matmul %0, %1, %cst {dimension_numbers = #tpu.dot_dimension_numbers<[1], [0], [0], [1], [0, 0, 1, 1], [], []>} : vector<8x32xf32>, vector<32x128xf32>, vector<8x128xf32> -> vector<8x128xf32>
    %c0_3 = arith.constant 0 : index
    %c0_4 = arith.constant 0 : index
    %3 = vector.load %arg3[%c0_3, %c0_4] : memref<1x128xf32, #tpu.memory_space<vmem>>, vector<1x128xf32>
    %4 = vector.broadcast %3 : vector<1x128xf32> to vector<8x128xf32>
    %5 = arith.addf %2, %4 : vector<8x128xf32>
    %cst_5 = arith.constant 0.000000e+00 : f32
    %6 = vector.broadcast %cst_5 : f32 to vector<8x128xf32>
    %7 = arith.maximumf %5, %6 : vector<8x128xf32>
    %c0_6 = arith.constant 0 : index
    %c0_7 = arith.constant 0 : index
    %8 = vector.load %arg4[%c0_6, %c0_7] : memref<128x128xf32, #tpu.memory_space<vmem>>, vector<128x128xf32>
    %cst_8 = arith.constant dense<0.000000e+00> : vector<8x128xf32>
    %9 = tpu.matmul %7, %8, %cst_8 {dimension_numbers = #tpu.dot_dimension_numbers<[1], [0], [0], [1], [0, 0, 1, 1], [], []>} : vector<8x128xf32>, vector<128x128xf32>, vector<8x128xf32> -> vector<8x128xf32>
    %c0_9 = arith.constant 0 : index
    %c0_10 = arith.constant 0 : index
    %10 = vector.load %arg5[%c0_9, %c0_10] : memref<1x128xf32, #tpu.memory_space<vmem>>, vector<1x128xf32>
    %11 = vector.broadcast %10 : vector<1x128xf32> to vector<8x128xf32>
    %12 = arith.addf %9, %11 : vector<8x128xf32>
    %cst_11 = arith.constant 0.000000e+00 : f32
    %13 = vector.broadcast %cst_11 : f32 to vector<8x128xf32>
    %14 = arith.maximumf %12, %13 : vector<8x128xf32>
    %c0_12 = arith.constant 0 : index
    %c0_13 = arith.constant 0 : index
    %15 = vector.load %arg6[%c0_12, %c0_13] : memref<1x128xf32, #tpu.memory_space<vmem>>, vector<1x128xf32>
    %16 = vector.broadcast %15 : vector<1x128xf32> to vector<8x128xf32>
    %17 = arith.mulf %14, %16 : vector<8x128xf32>
    %cst_14 = arith.constant dense<0.000000e+00> : vector<8xf32>
    %18 = vector.multi_reduction <add>, %17, %cst_14 [1] : vector<8x128xf32> to vector<8xf32>
    %19 = vector.shape_cast %18 : vector<8xf32> to vector<8x1xf32>
    %c0_15 = arith.constant 0 : index
    %c0_16 = arith.constant 0 : index
    %20 = vector.load %arg7[%c0_15, %c0_16] : memref<1x1xf32, #tpu.memory_space<vmem>>, vector<1x1xf32>
    %21 = vector.broadcast %20 : vector<1x1xf32> to vector<8x1xf32>
    %22 = arith.addf %19, %21 : vector<8x1xf32>
    %c0_17 = arith.constant 0 : index
    %c0_18 = arith.constant 0 : index
    %23 = vector.load %arg8[%c0_17, %c0_18] : memref<8x1xf32, #tpu.memory_space<vmem>>, vector<8x1xf32>
    tpu.vector_store %arg8[%c0_17, %c0_18], %22 {strides = array<i32>} : memref<8x1xf32, #tpu.memory_space<vmem>>, vector<8x1xf32>,
    return
  }
  func.func @transform_0(%arg0: i32) -> (i32, i32) {
    %c0_i32 = arith.constant 0 : i32
    %c0_i32_0 = arith.constant 0 : i32
    return %arg0, %c0_i32 : i32, i32
  }
  func.func @transform_1(%arg0: i32) -> (i32, i32) {
    %c0_i32 = arith.constant 0 : i32
    %c0_i32_0 = arith.constant 0 : i32
    %c0_i32_1 = arith.constant 0 : i32
    return %c0_i32, %c0_i32_0 : i32, i32
  }
  func.func @transform_2(%arg0: i32) -> (i32, i32) {
    %c0_i32 = arith.constant 0 : i32
    %c0_i32_0 = arith.constant 0 : i32
    %c0_i32_1 = arith.constant 0 : i32
    return %c0_i32, %c0_i32_0 : i32, i32
  }
  func.func @transform_3(%arg0: i32) -> (i32, i32) {
    %c0_i32 = arith.constant 0 : i32
    %c0_i32_0 = arith.constant 0 : i32
    %c0_i32_1 = arith.constant 0 : i32
    return %c0_i32, %c0_i32_0 : i32, i32
  }
  func.func @transform_4(%arg0: i32) -> (i32, i32) {
    %c0_i32 = arith.constant 0 : i32
    %c0_i32_0 = arith.constant 0 : i32
    %c0_i32_1 = arith.constant 0 : i32
    return %c0_i32, %c0_i32_0 : i32, i32
  }
  func.func @transform_5(%arg0: i32) -> (i32, i32) {
    %c0_i32 = arith.constant 0 : i32
    %c0_i32_0 = arith.constant 0 : i32
    %c0_i32_1 = arith.constant 0 : i32
    return %c0_i32, %c0_i32_0 : i32, i32
  }
  func.func @transform_6(%arg0: i32) -> (i32, i32) {
    %c0_i32 = arith.constant 0 : i32
    %c0_i32_0 = arith.constant 0 : i32
    %c0_i32_1 = arith.constant 0 : i32
    return %c0_i32, %c0_i32_0 : i32, i32
  }
  func.func @transform_7(%arg0: i32) -> (i32, i32) {
    %c0_i32 = arith.constant 0 : i32
    %c0_i32_0 = arith.constant 0 : i32
    return %arg0, %c0_i32 : i32, i32
  }
}

</mosaic_0001>

<bundles_post_ra>
// kernel: dnn_forward.1
= control target key start
LH: loop header
LB: loop body
LE: loop exit
PB: predicated region body
PF: predicated region fallthrough
CT: control target
= control target key end

     0   :  { %v339_v0 = vmov 0.0|0.0   ;;  %vm340_vm0 = vmmov 0   ;;  %v341_v4 = vmov 0.0   ;;  %vm40_vm1 = vcmask 261120   ;;  %s460_s1 = inlined_call_operand.vmem [shape: f32[32,128], index: 1, kind: input, shape index: {}]   ;;  %s461_s3 = inlined_call_operand.vmem [shape: f32[128,128], index: 3, kind: input, shape index: {}]   ;;  %s462_s0 = inlined_call_operand.vmem [shape: f32[8,32], index: 0, kind: input, shape index: {}]   ;;  %s463_s2 = inlined_call_operand.vmem [shape: f32[1,128], index: 2, kind: input, shape index: {}]   ;;  %s464_s6 = inlined_call_operand.<no memory space> [shape: f32[1,1], index: 6, kind: input, shape index: {}]   ;;  %s465_s4 = inlined_call_operand.vmem [shape: f32[1,128], index: 4, kind: input, shape index: {}]   ;;  %s466_s5 = inlined_call_operand.vmem [shape: f32[1,128], index: 5, kind: input, shape index: {}]   ;;  %s467_s7 = inlined_call_operand.vmem [shape: f32[8,1], index: 7, kind: output, shape index: {}]  }
   0x1   :  { %306 = vmatprep.subr.bf16.mxu0 %v339_v0  ;;  %v29_v1 = vld [vmem:[%s460_s1] sm:$0xff]  ;;  %v30_v2 = vld [vmem:[%s460_s1 + $0x8] sm:$0xff]  ;;  %v31_v3 = vld [vmem:[%s460_s1 + $0x10] sm:$0xff]  ;;  %268 = vmatprep.mubr.msk.f32.mxu0 %vm340_vm0, %v341_v4  ;;  %v12_v38 = vstv %s464_s6  ;;  %vm227_vm2 = vcmask 7168  }
   0x2   :  { %v307_v5 = vpack.c.bf16 %v30_v2, %v29_v1  ;;  %v32_v6 = vld [vmem:[%s460_s1 + $0x18] sm:$0xff]  ;;  %312 = vmatprep.subr.bf16.mxu1 %v339_v0  ;;  %v115_v7 = vld [vmem:[%s461_s3] sm:$0xff]  ;;  %303 = vmatprep.mubr.msk.f32.mxu1 %vm340_vm0, %v341_v4  ;;  %v116_v8 = vld [vmem:[%s461_s3 + $0x8] sm:$0xff]  ;;  %13 = vst [vmem:[#allocation2] sm:$0x1] %v12_v38 }
   0x3   :  { %v117_v9 = vld [vmem:[%s461_s3 + $0x10] sm:$0xff]  ;;  %v118_v10 = vld [vmem:[%s461_s3 + $0x18] sm:$0xff]  ;;  %v310_v11 = vpack.c.bf16 %v32_v6, %v31_v3  ;;  %v313_v12 = vpack.c.bf16 %v116_v8, %v115_v7  ;;  %v119_v14 = vld [vmem:[%s461_s3 + $0x20] sm:$0xff] }
   0x4   :  { %308 = vmatpush3.bf16.msra.mxu0 %v307_v5  ;;  %v316_v13 = vpack.c.bf16 %v118_v10, %v117_v9  ;;  %v120_v15 = vld [vmem:[%s461_s3 + $0x28] sm:$0xff]  ;;  %v28_v16 = vld [vmem:[%s462_s0] sm:$0xff]  ;;  %v121_v18 = vld [vmem:[%s461_s3 + $0x30] sm:$0xff] }
   0x5   :  { %309 = vmatprep.subr.bf16.mxu0 %v339_v0  ;;  %314 = vmatpush3.bf16.msra.mxu1 %v313_v12  ;;  %v319_v17 = vpack.c.bf16 %v120_v15, %v119_v14  ;;  %v122_v19 = vld [vmem:[%s461_s3 + $0x38] sm:$0xff]  ;;  %v123_v21 = vld [vmem:[%s461_s3 + $0x40] sm:$0xff]  ;;  %v124_v22 = vld [vmem:[%s461_s3 + $0x48] sm:$0xff] }
   0x6   :  { %315 = vmatprep.subr.bf16.mxu1 %v339_v0  ;;  %v322_v20 = vpack.c.bf16 %v122_v19, %v121_v18  ;;  %v325_v23 = vpack.c.bf16 %v124_v22, %v123_v21  ;;  %v125_v24 = vld [vmem:[%s461_s3 + $0x50] sm:$0xff]  ;;  %v126_v25 = vld [vmem:[%s461_s3 + $0x58] sm:$0xff]  ;;  %v127_v27 = vld [vmem:[%s461_s3 + $0x60] sm:$0xff] }
   0x7   :  { %v328_v26 = vpack.c.bf16 %v126_v25, %v125_v24  ;;  %v128_v28 = vld [vmem:[%s461_s3 + $0x68] sm:$0xff]  ;;  %v129_v30 = vld [vmem:[%s461_s3 + $0x70] sm:$0xff]  ;;  %v130_v31 = vld [vmem:[%s461_s3 + $0x78] sm:$0xff] }
   0x8   :  { %311 = vmatpush3.bf16.msra.mxu0 %v310_v11  ;;  %v331_v29 = vpack.c.bf16 %v128_v28, %v127_v27  ;;  %v334_v32 = vpack.c.bf16 %v130_v31, %v129_v30  ;;  %v233_v33 = vld [vmem:[%s463_s2] ss:$0 sm:$0xff] }
   0x9   :  { %317 = vmatpush3.bf16.msra.mxu1 %v316_v13  ;;  %v235_v39 = vld [vmem:[%s465_s4] ss:$0 sm:$0xff] }
   0xa   :  { %318 = vmatprep.subr.bf16.mxu1 %v339_v0  ;;  %v236_v43 = vld [vmem:[%s466_s5] ss:$0 sm:$0xff] }
   0xb   :  { %269 = vmatmul.mubr.msk.f32.vlgmr.msra.gmra.mrb[0].mxu0 %vm40_vm1, %v28_v16  ;;  %v237_v46 = vld [vmem:[#allocation2] ss:$0 sm:$0xff] }
   0xd   :  { %320 = vmatpush3.bf16.msra.mxu1 %v319_v17 }
   0xe   :  { %321 = vmatprep.subr.bf16.mxu1 %v339_v0 }
  0x11   :  { %323 = vmatpush3.bf16.msra.mxu1 %v322_v20 }
  0x12   :  { %324 = vmatprep.subr.bf16.mxu1 %v339_v0 }
  0x15   :  { %326 = vmatpush3.bf16.msra.mxu1 %v325_v23 }
  0x16   :  { %327 = vmatprep.subr.bf16.mxu1 %v339_v0 }
  0x19   :  { %329 = vmatpush3.bf16.msra.mxu1 %v328_v26 }
  0x1a   :  { %330 = vmatprep.subr.bf16.mxu1 %v339_v0 }
  0x1d   :  { %332 = vmatpush3.bf16.msra.mxu1 %v331_v29 }
  0x1e   :  { %333 = vmatprep.subr.bf16.mxu1 %v339_v0 }
  0x21   :  { %335 = vmatpush3.bf16.msra.mxu1 %v334_v32 }
  0xde   :  { %v110_v34 = vpop.f32.mrb[0].mxu0 }
  0xdf   :  { %v111_v35 = vadd.f32 %v233_v33, %v110_v34  ;;  %v270_v36 = vpop.f32.mrb[1].mxu0 }
  0xe1   :  { %v114_v37 = vmax.f32 %v111_v35, 0.0 }
  0xe3   :  { %304 = vmatmul.mubr.f32.vlgmr.msra.gmra.mrb[0].mxu1 %v114_v37 }
 0x1b6   :  { %v204_v40 = vpop.f32.mrb[0].mxu1 }
 0x1b7   :  { %v205_v41 = vadd.f32 %v235_v39, %v204_v40  ;;  %v305_v42 = vpop.f32.mrb[1].mxu1 }
 0x1b9   :  { %v208_v44 = vmax.f32 %v205_v41, 0.0 }
 0x1bb   :  { %v216_v45 = vmul.f32 %v236_v43, %v208_v44 }
 0x1bd   :  { %217 = vadd.xlane.f32.xlu0 %v216_v45 }
 0x24a   :  { %v218_v47 = vpop.xlane.xlu0 %217 }
 0x24b   :  { %v226_v48 = vadd.f32 %v237_v46, %v218_v47 }
 0x24d   :  { %228 = vst.msk [vmem:[%s467_s7] sm:$0xff] %vm227_vm2, %v226_v48 }

</bundles_post_ra>
